<compile_context>
chip_gen: v7x
topology: tpu7x:2x2x1
jax: 0.10.0
libtpu: 0.0.40
codegen_flags: <defaults>
</compile_context>

<pallas_src>
import functools

import jax
import jax.numpy as jnp
import numpy as np
from jax.experimental import pallas as pl
from jax.experimental.pallas import tpu as pltpu


def _round_up(x, m):
    return ((x + m - 1) // m) * m


def _vmem_capacity_bytes():
    try:
        info = pltpu.get_tpu_info()
        cap = getattr(info, "vmem_capacity_bytes", None)
        if cap:
            return int(cap)
    except Exception:
        pass
    return 64 << 20  # conservative (v7x-sized) default


# --------------------- single-pass fused kernel ------------------------------
def _adailn_fused_kernel(x_ref, gb_ref, rho_ref, o_ref, *, eps, hw_true):
    # x_ref:   (Bt, C, HW_pad)   batch tile, spatially flattened (lane-dense)
    # gb_ref:  (Bt, C, 2)        packed [gamma, beta]
    # rho_ref: (C, 1)            IN/LN mixing weight (shared across batch)
    x = x_ref[...].astype(jnp.float32)
    _, C, _ = x.shape

    # One-pass sums; zero padding of the lane dim contributes nothing.
    s1 = jnp.sum(x, axis=2, keepdims=True)                 # (Bt, C, 1)
    s2 = jnp.sum(x * x, axis=2, keepdims=True)             # (Bt, C, 1)

    # Instance-norm stats (per batch element, per channel), unbiased like torch.var.
    n_in = float(hw_true)
    ddof_in = float(max(hw_true - 1, 1))
    in_mean = s1 * (1.0 / n_in)
    in_ssd = jnp.maximum(s2 - s1 * in_mean, 0.0)
    r_in = jax.lax.rsqrt(in_ssd * (1.0 / ddof_in) + eps)   # EUP

    # Layer-norm stats from the per-channel partial sums (no second full pass).
    n_ln = float(C * hw_true)
    ddof_ln = float(max(C * hw_true - 1, 1))
    ln_s1 = jnp.sum(s1, axis=1, keepdims=True)             # (Bt, 1, 1)
    ln_s2 = jnp.sum(s2, axis=1, keepdims=True)
    ln_mean = ln_s1 * (1.0 / n_ln)
    ln_ssd = jnp.maximum(ln_s2 - ln_s1 * ln_mean, 0.0)
    r_ln = jax.lax.rsqrt(ln_ssd * (1.0 / ddof_ln) + eps)

    gb = gb_ref[...].astype(jnp.float32)                   # (Bt, C, 2)
    gamma = gb[:, :, 0:1]
    beta = gb[:, :, 1:2]
    rho = rho_ref[...].astype(jnp.float32)[None, :, :]     # (1, C, 1)

    # Fused per-channel affine: out = x * scale + offset (single FMA hot loop).
    mix_r = rho * r_in + (1.0 - rho) * r_ln                # (Bt, C, 1)
    mix_mu = rho * (in_mean * r_in) + (1.0 - rho) * (ln_mean * r_ln)
    scale = gamma * mix_r
    offset = beta - gamma * mix_mu
    o_ref[...] = (x * scale + offset).astype(o_ref.dtype)


# --------------------- two-phase fallback kernels -----------------------------
def _adailn_stats_kernel(x_ref, s_ref):
    # Accumulate per-(b, c) sum and sum-of-squares over the HW-tiled axis.
    @pl.when(pl.program_id(1) == 0)
    def _():
        s_ref[...] = jnp.zeros_like(s_ref)

    x = x_ref[...].astype(jnp.float32)                     # (1, C, hw_tile)
    s1 = jnp.sum(x, axis=2, keepdims=True)
    s2 = jnp.sum(x * x, axis=2, keepdims=True)
    s_ref[...] += jnp.concatenate([s1, s2], axis=2)


def _adailn_apply_kernel(x_ref, so_ref, o_ref):
    x = x_ref[...].astype(jnp.float32)                     # (1, C, hw_tile)
    so = so_ref[...]                                       # (1, C, 2) f32
    o_ref[...] = (x * so[:, :, 0:1] + so[:, :, 1:2]).astype(o_ref.dtype)


# --------------------- wrapper -------------------------------------------------
def ada_iln(x, gamma, beta, rho, *, eps=1e-5, force_two_phase=False,
            two_phase_hw_tile=None):
    """adaILN forward. x: (B, C, H, W); gamma, beta: (B, C); rho: (1, C, 1, 1)."""
    B, C, H, W = x.shape
    HW = H * W
    itemsize = x.dtype.itemsize

    # Lane-dense last dim: pad flattened spatial dim to a multiple of 128.
    # Zero padding is stats-safe because stats use one-pass sums.
    HW_pad = _round_up(HW, 128)
    x3 = x.reshape(B, C, HW)
    if HW_pad != HW:
        x3 = jnp.pad(x3, ((0, 0), (0, 0), (0, HW_pad - HW)))

    vmem_cap = _vmem_capacity_bytes()
    usable = max(vmem_cap - (8 << 20), 16 << 20)
    # ~4 MiB blocks on 64 MiB parts (v7x), ~8 MiB on 128 MiB parts (v5e/v6e).
    max_block_bytes = max(2 << 20, vmem_cap // 16)

    c_pad = _round_up(C, 8)
    per_elem_bytes = C * HW_pad * itemsize
    per_elem_f32 = C * HW_pad * 4

    # Single-pass fits if one element's double-buffered in/out blocks plus the
    # f32 upcast/temporaries fit VMEM (~8 MiB/elem on v7x, ~17 MiB on 128 MiB).
    single_pass = (not force_two_phase) and (
        4 * per_elem_bytes + 3 * per_elem_f32 <= usable)

    if single_pass:
        # Pack gamma/beta into one (B, C, 2) slab (one DMA, layout matches the
        # (Bt, C, 1) stats); its lane-padded footprint is counted below.
        gb = jnp.stack([gamma.astype(x.dtype), beta.astype(x.dtype)], axis=-1)
        rho2 = rho.reshape(C, 1).astype(x.dtype)

        # Prefer step count over block size: per-step overhead (~0.35 us) is
        # negligible, but a 1-step grid has nothing to pipeline and idles one
        # TensorCore on v7x.  Aim for >= min(B, 4) steps, even count if B even.
        bt_cap_steps = max(1, B // 4)
        bt_cap_vmem = max(1, max_block_bytes // max(per_elem_bytes, 1))
        bt = max(1, min(B, bt_cap_steps, bt_cap_vmem))
        while B % bt != 0:
            bt -= 1
        if B % 2 == 0 and (B // bt) % 2 == 1:
            while bt > 1 and (B % bt != 0 or (B // bt) % 2 == 1):
                bt -= 1
        steps = B // bt

        # VMEM budget: double-buffered in/out blocks + f32 upcast/temps +
        # lane-padded (128-wide) per-channel param/stat buffers.
        block_in = bt * per_elem_bytes
        block_f32 = bt * per_elem_f32
        small = (4 * bt * c_pad * 128 * itemsize     # gb (double-buffered, padded)
                 + 2 * c_pad * 128 * itemsize        # rho
                 + 10 * bt * c_pad * 128 * 4)        # f32 per-channel stat temps
        vmem_needed = 4 * block_in + 3 * block_f32 + small + (2 << 20)
        vmem_limit = int(min(max(vmem_needed, 16 << 20),
                             max(vmem_cap - (2 << 20), 16 << 20)))

        cost = pl.CostEstimate(
            flops=int(5 * B * C * HW),
            transcendentals=int(B * C + B),
            bytes_accessed=int(2 * B * C * HW_pad * itemsize),
        )

        out = pl.pallas_call(
            functools.partial(_adailn_fused_kernel, eps=eps, hw_true=HW),
            out_shape=jax.ShapeDtypeStruct((B, C, HW_pad), x.dtype),
            grid_spec=pltpu.PrefetchScalarGridSpec(
                num_scalar_prefetch=0,
                grid=(steps,),
                in_specs=[
                    pl.BlockSpec((bt, C, HW_pad), lambda b: (b, 0, 0)),
                    pl.BlockSpec((bt, C, 2), lambda b: (b, 0, 0)),
                    pl.BlockSpec((C, 1), lambda b: (0, 0)),
                ],
                out_specs=pl.BlockSpec((bt, C, HW_pad), lambda b: (b, 0, 0)),
            ),
            compiler_params=pltpu.CompilerParams(
                dimension_semantics=("parallel",),
                vmem_limit_bytes=vmem_limit,
            ),
            cost_estimate=cost,
        )(x3, gb, rho2)
    else:
        # Two-phase HW-tiled fallback: stats accumulation over HW tiles, tiny
        # plain-JAX fold into per-(b, c) scale/offset, then a tiled apply pass.
        if two_phase_hw_tile is not None:
            hw_tile = int(two_phase_hw_tile)
        else:
            hw_tile = 128
            n128 = HW_pad // 128
            for t in range(n128, 0, -1):
                if n128 % t == 0 and C * t * 128 * itemsize <= max_block_bytes:
                    hw_tile = t * 128
                    break
        n_hw = HW_pad // hw_tile

        blk = C * hw_tile * itemsize
        blk_f32 = C * hw_tile * 4
        small = 8 * c_pad * 128 * 4
        vmem_a = int(min(max(2 * blk + 2 * blk_f32 + small + (2 << 20), 16 << 20),
                         max(vmem_cap - (2 << 20), 16 << 20)))
        vmem_b = int(min(max(4 * blk + 2 * blk_f32 + small + (2 << 20), 16 << 20),
                         max(vmem_cap - (2 << 20), 16 << 20)))

        stats = pl.pallas_call(
            _adailn_stats_kernel,
            out_shape=jax.ShapeDtypeStruct((B, C, 2), jnp.float32),
            grid_spec=pltpu.PrefetchScalarGridSpec(
                num_scalar_prefetch=0,
                grid=(B, n_hw),
                in_specs=[pl.BlockSpec((1, C, hw_tile), lambda b, h: (b, 0, h))],
                out_specs=pl.BlockSpec((1, C, 2), lambda b, h: (b, 0, 0)),
            ),
            compiler_params=pltpu.CompilerParams(
                dimension_semantics=("parallel", "arbitrary"),
                vmem_limit_bytes=vmem_a,
            ),
            cost_estimate=pl.CostEstimate(
                flops=int(3 * B * C * HW_pad),
                transcendentals=0,
                bytes_accessed=int(B * C * HW_pad * itemsize),
            ),
        )(x3)

        # Tiny (B, C) math: fold IN/LN stats + rho/gamma/beta into scale/offset.
        s1 = stats[:, :, 0]
        s2 = stats[:, :, 1]
        n_in = float(HW)
        ddof_in = float(max(HW - 1, 1))
        in_mean = s1 / n_in
        r_in = jax.lax.rsqrt(jnp.maximum(s2 - s1 * in_mean, 0.0) / ddof_in + eps)
        n_ln = float(C * HW)
        ddof_ln = float(max(C * HW - 1, 1))
        ln_s1 = jnp.sum(s1, axis=1, keepdims=True)
        ln_s2 = jnp.sum(s2, axis=1, keepdims=True)
        ln_mean = ln_s1 / n_ln
        r_ln = jax.lax.rsqrt(jnp.maximum(ln_s2 - ln_s1 * ln_mean, 0.0) / ddof_ln + eps)
        rho_c = rho.reshape(1, C).astype(jnp.float32)
        g = gamma.astype(jnp.float32)
        b_ = beta.astype(jnp.float32)
        mix_r = rho_c * r_in + (1.0 - rho_c) * r_ln
        mix_mu = rho_c * (in_mean * r_in) + (1.0 - rho_c) * (ln_mean * r_ln)
        so = jnp.stack([g * mix_r, b_ - g * mix_mu], axis=-1)   # (B, C, 2) f32

        out = pl.pallas_call(
            _adailn_apply_kernel,
            out_shape=jax.ShapeDtypeStruct((B, C, HW_pad), x.dtype),
            grid_spec=pltpu.PrefetchScalarGridSpec(
                num_scalar_prefetch=0,
                grid=(B, n_hw),
                in_specs=[
                    pl.BlockSpec((1, C, hw_tile), lambda b, h: (b, 0, h)),
                    pl.BlockSpec((1, C, 2), lambda b, h: (b, 0, 0)),
                ],
                out_specs=pl.BlockSpec((1, C, hw_tile), lambda b, h: (b, 0, h)),
            ),
            compiler_params=pltpu.CompilerParams(
                dimension_semantics=("parallel", "parallel"),
                vmem_limit_bytes=vmem_b,
            ),
            cost_estimate=pl.CostEstimate(
                flops=int(2 * B * C * HW_pad),
                transcendentals=0,
                bytes_accessed=int(2 * B * C * HW_pad * itemsize),
            ),
        )(x3, so)

    if HW_pad != HW:
        out = out[:, :, :HW]
    return out.reshape(B, C, H, W)


def ada_iln_ref(x, gamma, beta, rho, *, eps=1e-5):
    """Pure-JAX reference matching the PyTorch forward exactly."""
    x = x.astype(jnp.float32)
    in_mean = jnp.mean(x, axis=(2, 3), keepdims=True)
    in_var = jnp.var(x, axis=(2, 3), keepdims=True, ddof=1)
    out_in = (x - in_mean) / jnp.sqrt(in_var + eps)
    ln_mean = jnp.mean(x, axis=(1, 2, 3), keepdims=True)
    ln_var = jnp.var(x, axis=(1, 2, 3), keepdims=True, ddof=1)
    out_ln = (x - ln_mean) / jnp.sqrt(ln_var + eps)
    out = rho * out_in + (1.0 - rho) * out_ln
    out = out * gamma[:, :, None, None] + beta[:, :, None, None]
    return out


if __name__ == "__main__":
    B, C, H, W = 2, 4, 16, 16
    key = jax.random.PRNGKey(0)
    kx, kg, kb = jax.random.split(key, 3)

    x = jax.random.normal(kx, (B, C, H, W), dtype=jnp.float32)
    gamma = jax.random.normal(kg, (B, C), dtype=jnp.float32)
    beta = jax.random.normal(kb, (B, C), dtype=jnp.float32)
    # Parameter rho initialized as in the module: fill_(0.9), shape (1, C, 1, 1)
    rho = jnp.full((1, C, 1, 1), 0.9, dtype=jnp.float32)

    ref = ada_iln_ref(x, gamma, beta, rho)

    # Single-pass fused path (default).
    out = jax.block_until_ready(ada_iln(x, gamma, beta, rho))
    np.testing.assert_allclose(np.asarray(out), np.asarray(ref), rtol=1e-4, atol=1e-5)

    # Exercise the HW-tiled two-phase fallback (used for slabs that exceed VMEM).
    out2 = jax.block_until_ready(
        ada_iln(x, gamma, beta, rho, force_two_phase=True, two_phase_hw_tile=128))
    np.testing.assert_allclose(np.asarray(out2), np.asarray(ref), rtol=1e-4, atol=1e-5)

    print("KERNEL_OK")
</pallas_src>

<mosaic_0001>
module attributes {stable_mosaic.version = 11 : i64} {
  func.func @_adailn_fused_kernel(%arg0: i32, %arg1: memref<1x4x256xf32, #tpu.memory_space<vmem>>, %arg2: memref<1x4x2xf32, #tpu.memory_space<vmem>>, %arg3: memref<4x1xf32, #tpu.memory_space<vmem>>, %arg4: memref<1x4x256xf32, #tpu.memory_space<vmem>>) attributes {dimension_semantics = [#tpu.dimension_semantics<parallel>], iteration_bounds = array<i64: 2>, scalar_prefetch = 0 : i64, scratch_operands = 0 : i64, tpu.core_type = #tpu.core_type<tc>, window_params = [{transform_indices = @transform_0, window_bounds = array<i64: 1, 4, 256>}, {transform_indices = @transform_1, window_bounds = array<i64: 1, 4, 2>}, {pipeline_mode = #tpu.pipeline_mode<synchronous>, transform_indices = @transform_2, window_bounds = array<i64: 4, 1>}, {transform_indices = @transform_3, window_bounds = array<i64: 1, 4, 256>}]} {
    %c0 = arith.constant 0 : index
    %c0_0 = arith.constant 0 : index
    %c0_1 = arith.constant 0 : index
    %0 = vector.load %arg1[%c0, %c0_0, %c0_1] : memref<1x4x256xf32, #tpu.memory_space<vmem>>, vector<1x4x256xf32>
    %cst = arith.constant dense<0.000000e+00> : vector<1x4xf32>
    %1 = vector.multi_reduction <add>, %0, %cst [2] : vector<1x4x256xf32> to vector<1x4xf32>
    %2 = vector.shape_cast %1 : vector<1x4xf32> to vector<1x4x1xf32>
    %3 = arith.mulf %0, %0 : vector<1x4x256xf32>
    %cst_2 = arith.constant dense<0.000000e+00> : vector<1x4xf32>
    %4 = vector.multi_reduction <add>, %3, %cst_2 [2] : vector<1x4x256xf32> to vector<1x4xf32>
    %5 = vector.shape_cast %4 : vector<1x4xf32> to vector<1x4x1xf32>
    %cst_3 = arith.constant 3.906250e-03 : f32
    %6 = vector.broadcast %cst_3 : f32 to vector<1x4x1xf32>
    %7 = arith.mulf %2, %6 : vector<1x4x1xf32>
    %8 = arith.mulf %2, %7 : vector<1x4x1xf32>
    %9 = arith.subf %5, %8 : vector<1x4x1xf32>
    %cst_4 = arith.constant 0.000000e+00 : f32
    %10 = vector.broadcast %cst_4 : f32 to vector<1x4x1xf32>
    %11 = arith.maximumf %9, %10 : vector<1x4x1xf32>
    %cst_5 = arith.constant 0.00392156886 : f32
    %12 = vector.broadcast %cst_5 : f32 to vector<1x4x1xf32>
    %13 = arith.mulf %11, %12 : vector<1x4x1xf32>
    %cst_6 = arith.constant 9.99999974E-6 : f32
    %14 = vector.broadcast %cst_6 : f32 to vector<1x4x1xf32>
    %15 = arith.addf %13, %14 : vector<1x4x1xf32>
    %16 = math.rsqrt %15 : vector<1x4x1xf32>
    %cst_7 = arith.constant dense<0.000000e+00> : vector<1x1xf32>
    %17 = vector.multi_reduction <add>, %2, %cst_7 [1] : vector<1x4x1xf32> to vector<1x1xf32>
    %18 = vector.shape_cast %17 : vector<1x1xf32> to vector<1x1x1xf32>
    %cst_8 = arith.constant dense<0.000000e+00> : vector<1x1xf32>
    %19 = vector.multi_reduction <add>, %5, %cst_8 [1] : vector<1x4x1xf32> to vector<1x1xf32>
    %20 = vector.shape_cast %19 : vector<1x1xf32> to vector<1x1x1xf32>
    %cst_9 = arith.constant 9.765625E-4 : f32
    %21 = vector.broadcast %cst_9 : f32 to vector<1x1x1xf32>
    %22 = arith.mulf %18, %21 : vector<1x1x1xf32>
    %23 = arith.mulf %18, %22 : vector<1x1x1xf32>
    %24 = arith.subf %20, %23 : vector<1x1x1xf32>
    %cst_10 = arith.constant 0.000000e+00 : f32
    %25 = vector.broadcast %cst_10 : f32 to vector<1x1x1xf32>
    %26 = arith.maximumf %24, %25 : vector<1x1x1xf32>
    %cst_11 = arith.constant 9.77517105E-4 : f32
    %27 = vector.broadcast %cst_11 : f32 to vector<1x1x1xf32>
    %28 = arith.mulf %26, %27 : vector<1x1x1xf32>
    %cst_12 = arith.constant 9.99999974E-6 : f32
    %29 = vector.broadcast %cst_12 : f32 to vector<1x1x1xf32>
    %30 = arith.addf %28, %29 : vector<1x1x1xf32>
    %31 = math.rsqrt %30 : vector<1x1x1xf32>
    %c0_13 = arith.constant 0 : index
    %c0_14 = arith.constant 0 : index
    %c0_15 = arith.constant 0 : index
    %32 = vector.load %arg2[%c0_13, %c0_14, %c0_15] : memref<1x4x2xf32, #tpu.memory_space<vmem>>, vector<1x4x2xf32>
    %33 = vector.extract_strided_slice %32 {offsets = [0, 0, 0], sizes = [1, 4, 1], strides = [1, 1, 1]} : vector<1x4x2xf32> to vector<1x4x1xf32>
    %34 = vector.extract_strided_slice %32 {offsets = [0, 0, 1], sizes = [1, 4, 1], strides = [1, 1, 1]} : vector<1x4x2xf32> to vector<1x4x1xf32>
    %c0_16 = arith.constant 0 : index
    %c0_17 = arith.constant 0 : index
    %35 = vector.load %arg3[%c0_16, %c0_17] : memref<4x1xf32, #tpu.memory_space<vmem>>, vector<4x1xf32>
    %36 = vector.shape_cast %35 : vector<4x1xf32> to vector<1x4x1xf32>
    %37 = arith.mulf %36, %16 : vector<1x4x1xf32>
    %cst_18 = arith.constant 1.000000e+00 : f32
    %38 = vector.broadcast %cst_18 : f32 to vector<1x4x1xf32>
    %39 = arith.subf %38, %36 : vector<1x4x1xf32>
    %40 = vector.broadcast %31 : vector<1x1x1xf32> to vector<1x4x1xf32>
    %41 = arith.mulf %39, %40 : vector<1x4x1xf32>
    %42 = arith.addf %37, %41 : vector<1x4x1xf32>
    %43 = arith.mulf %7, %16 : vector<1x4x1xf32>
    %44 = arith.mulf %36, %43 : vector<1x4x1xf32>
    %cst_19 = arith.constant 1.000000e+00 : f32
    %45 = vector.broadcast %cst_19 : f32 to vector<1x4x1xf32>
    %46 = arith.subf %45, %36 : vector<1x4x1xf32>
    %47 = arith.mulf %22, %31 : vector<1x1x1xf32>
    %48 = vector.broadcast %47 : vector<1x1x1xf32> to vector<1x4x1xf32>
    %49 = arith.mulf %46, %48 : vector<1x4x1xf32>
    %50 = arith.addf %44, %49 : vector<1x4x1xf32>
    %51 = arith.mulf %33, %42 : vector<1x4x1xf32>
    %52 = arith.mulf %33, %50 : vector<1x4x1xf32>
    %53 = arith.subf %34, %52 : vector<1x4x1xf32>
    %54 = vector.broadcast %51 : vector<1x4x1xf32> to vector<1x4x256xf32>
    %55 = arith.mulf %0, %54 : vector<1x4x256xf32>
    %56 = vector.broadcast %53 : vector<1x4x1xf32> to vector<1x4x256xf32>
    %57 = arith.addf %55, %56 : vector<1x4x256xf32>
    %c0_20 = arith.constant 0 : index
    %c0_21 = arith.constant 0 : index
    %c0_22 = arith.constant 0 : index
    %58 = vector.load %arg4[%c0_20, %c0_21, %c0_22] : memref<1x4x256xf32, #tpu.memory_space<vmem>>, vector<1x4x256xf32>
    tpu.vector_store %arg4[%c0_20, %c0_21, %c0_22], %57 {strides = array<i32>} : memref<1x4x256xf32, #tpu.memory_space<vmem>>, vector<1x4x256xf32>,
    return
  }
  func.func @transform_0(%arg0: i32) -> (i32, i32, i32) {
    %c0_i32 = arith.constant 0 : i32
    %c0_i32_0 = arith.constant 0 : i32
    %c0_i32_1 = arith.constant 0 : i32
    return %arg0, %c0_i32, %c0_i32_0 : i32, i32, i32
  }
  func.func @transform_1(%arg0: i32) -> (i32, i32, i32) {
    %c0_i32 = arith.constant 0 : i32
    %c0_i32_0 = arith.constant 0 : i32
    %c0_i32_1 = arith.constant 0 : i32
    return %arg0, %c0_i32, %c0_i32_0 : i32, i32, i32
  }
  func.func @transform_2(%arg0: i32) -> (i32, i32) {
    %c0_i32 = arith.constant 0 : i32
    %c0_i32_0 = arith.constant 0 : i32
    %c0_i32_1 = arith.constant 0 : i32
    return %c0_i32, %c0_i32_0 : i32, i32
  }
  func.func @transform_3(%arg0: i32) -> (i32, i32, i32) {
    %c0_i32 = arith.constant 0 : i32
    %c0_i32_0 = arith.constant 0 : i32
    %c0_i32_1 = arith.constant 0 : i32
    return %arg0, %c0_i32, %c0_i32_0 : i32, i32, i32
  }
}

</mosaic_0001>

<bundles_post_ra>
// kernel: tpu_custom_call.1
= control target key start
LH: loop header
LB: loop body
LE: loop exit
PB: predicated region body
PF: predicated region fallthrough
CT: control target
= control target key end

     0   :  { %8 = vsyncpa [#allocation3], 0  ;;  %s642_s0 = inlined_call_operand.vmem [shape: f32[2,4,256], index: 0, kind: input, shape index: {}]   ;;  %s643_s1 = inlined_call_operand.vmem [shape: f32[2,4,2], index: 1, kind: input, shape index: {}]   ;;  %s644_s2 = inlined_call_operand.vmem [shape: f32[4,1], index: 2, kind: input, shape index: {}]   ;;  %s645_s3 = inlined_call_operand.hbm [shape: f32[2,4,256], index: 3, kind: output, shape index: {}]  }
   0x1   :  { %10 = vsyncpa [#allocation3 + $0x1], 0  ;;  %s518_s12 = smov 0   ;;  %s520_s13 = smov 0  }
   0x2   :  { %s522_s14 = smov 0   ;;  %s524_s15 = smov 0  }
   0x3 LB: > { %s539_s16 = sadd.s32 4294967295, %s491_s15   ;;  %s364_s17 = sadd.s32 4294967294, %s491_s15   ;;  %s491_s15 = sphi %s524_s15, %s651_s15   ;;  %s487_s14 = sphi %s522_s14, %s650_s14   ;;  %s483_s13 = sphi %s520_s13, %s649_s13   ;;  %s479_s12 = sphi %s518_s12, %s648_s12  }
   0x4   : > { %s543_s18 = sadd.s32 1, %s491_s15   ;;  %s96_s19 = sadd.s32 1, %s487_s14 }
   0x5   : > { %s93_s20 = ssub.s32 %s491_s15, %s543_s18  ;;  %p106_p0 = scmp.ne.s32.totalorder %s487_s14, %s483_s13 }
   0x6   : > { %p94_p1 = scmp.eq.s32.totalorder %s93_s20, 0  ;;  %p107_p2 = scmp.eq.s32.totalorder %s539_s16, 1 }
   0x7   : > { %p112_p3 = scmp.ne.s32.totalorder %s483_s13, %s479_s12  ;;  %p113_p4 = scmp.eq.s32.totalorder %s364_s17, 1 }
   0x8   : > { %s554_s21 = scalar_select %p94_p1, %s487_s14, %s96_s19  }
   0x9   : > { %p556_p5 = por %p107_p2, %p106_p0  ;;  %p560_p6 = por %p113_p4, %p112_p3 }
   0xa   : > { %p367_p7 = scmp.ge.s32.totalorder %s491_s15, 1  ;;  %p149_p8 = scmp.lt.s32.totalorder %s491_s15, 3 }
   0xc   : > { %p150_p9 = pnand %p367_p7, %p149_p8 }
   0xd   : > { %p177_p10 = scmp.lt.s32.totalorder (!%p150_p9), %s539_s16, 1  ;;  %vm190_vm0 = vcmask (!%p150_p9), 1043456   ;;  %v493_v10 = vmov (!%p150_p9), 0   ;;  %v494_v40 = vmov (!%p150_p9), 1   ;;  %v234_v41 = vld [vmem:[%s644_s2] sm:$0xf] (!%p150_p9)  ;;  %v258_v59 = vlaneseq (!%p150_p9) }
   0xe   : > { %153 = sbr.rel (%p150_p9) target bundleno = 480 (0x1e0), region = 32  ;;  %422 = vset.pattern.permute.xlu1 (!%p150_p9), %v493_v10  ;;  %423 = vset.pattern.permute.xlu0 (!%p150_p9), %v494_v40  ;;  %v236_v42 = vsub.f32 (!%p150_p9), 1.0, %v234_v41  ;;  %s495_s8 = smov (!%p150_p9), 1   ;;  %v496_v57 = vmov (!%p150_p9), 839922192  }
   0xf   : > { %v256_v58 = vunpack.c.l.s4 (!%p150_p9), %v496_v57  ;;  %v259_v61 = vshrl.u32 (!%p150_p9), %v258_v59, 7  ;;  %s174_s9 = sand.u32 (!%p150_p9), 1, %s483_s13   ;;  %s378_s11 = sshll.u32 (!%p150_p9), %s539_s16, 7 }
  0x10   : > { %s368_s10 = sshll.u32 (!%p150_p9), %s174_s9, 3  ;;  %s279_s26 = scalar_lea.sflag (!%p150_p9), [#allocation3], %s174_s9 }
  0x11   : > { %v257_v60 = vunpack.c.0.s8 (!%p150_p9), %v256_v58  ;;  %s176_s17 = scalar_lea.vmem (!%p150_p9), [#allocation2], %s368_s10 }
  0x12   : > { %s293_s19 = sshll.u32 (!%p150_p9), %s176_s17, 4  ;;  %s602_s19 = int_to_ptr.vmem [resolvable:$true] %s293_s19 }
  0x13   : > { %v260_v62 = vsub.s32 (!%p150_p9), %v257_v60, %v259_v61  ;;  %s429_s27 = scalar_lea.vmem (!%p150_p9), %s602_s19, 128 }
  0x14   : > { %p430_p11 = scmp.ne.s32.totalorder (!%p150_p9), %s602_s19, %s429_s27 }
  0x15   : > { %s568_s24 = scalar_select %p177_p10, %s539_s16, 1 }
  0x16   : > { %p431_p12 = pnand %p430_p11, %p556_p5  ;;  %s497_s16 = smov [#allocation2]  }
  0x17   : > { %s377_s25 = sshll.u32 %s568_s24, 3  ;;  %s371_s4 = sshll.u32 %s568_s24, 2 }
  0x18   : > { %s181_s28 = scalar_lea.vmem %s642_s0, %s377_s25  ;;  %s185_s7 = scalar_lea.vmem %s643_s1, %s371_s4 }
  0x19   : > { %v574_v0 = vld [vmem:[%s181_s28] sm:$0xff]  ;;  %s600_s25 = scalar_lea.hbm %s645_s3, %s378_s11  ;;  %p432_p13 = pneg %p431_p12 }
  0x1a   : > { %v188_v1 = vcombine.high %v574_v0, %v574_v0  ;;  %v191_v2 = vsel %vm190_vm0, %v574_v0, 0.0  ;;  %v196_v3 = vmul.f32 %v574_v0, %v574_v0  ;;  %v233_v51 = vld [vmem:[%s185_s7] sm:$0xf]  ;;  %s433_s28 = sshll.u32 %s497_s16, 4  ;;  %s434_s28 = int_to_ptr.vmem [resolvable:$false] %s433_s28 }
  0x1b   : > { %s435_s29 = scalar_lea.vmem %s434_s28, 256  ;;  %p436_p0 = scmp.lt.s32.totalorder %s602_s19, %s434_s28 }
  0x1c   : > { %v192_v4 = vsel %vm190_vm0, %v188_v1, 0.0  ;;  %v198_v5 = vcombine.high %v196_v3, %v196_v3  ;;  %v200_v6 = vsel %vm190_vm0, %v196_v3, 0.0  ;;  %p437_p1 = scmp.lt.s32.totalorder %s435_s29, %s429_s27 }
  0x1d   : > { %v193_v7 = vadd.f32 %v192_v4, %v191_v2 }
  0x1e   : > { %v201_v8 = vsel %vm190_vm0, %v198_v5, 0.0  ;;  %p438_p2 = por %p437_p1, %p436_p0 }
  0x1f   : > { %194 = vadd.xlane.f32.xlu0 %v193_v7  ;;  %v202_v9 = vadd.f32 %v201_v8, %v200_v6 }
  0x20   : > { %p439_p3 = pnand %p438_p2, %p432_p13 }
  0x23   : > { %203 = vadd.xlane.f32.xlu0 %v202_v9 }
  0xac   : > { %v195_v11 = vpop.xlane.xlu0 %194 }
  0xad   : > { %v205_v12 = vmul.f32 0.00390625, %v195_v11  ;;  %v212_v13 = vsel %vm190_vm0, %v195_v11, 0.0 }
  0xae   : > { %v213_v14 = vrot.slane %v212_v13, 4 }
  0xaf   : > { %v206_v15 = vmul.f32 %v205_v12, %v195_v11 }
  0xb0   : > { %v214_v16 = vadd.f32 %v213_v14, %v212_v13  ;;  %v204_v17 = vpop.xlane.xlu0 %203 }
  0xb1   : > { %v219_v18 = vsel %vm190_vm0, %v204_v17, 0.0  ;;  %v207_v20 = vsub.f32 %v204_v17, %v206_v15 }
  0xb2   : > { %v215_v19 = vrot.slane %v214_v16, 2  ;;  %v220_v21 = vrot.slane %v219_v18, 4 }
  0xb3   : > { %v208_v25 = vmax.f32 %v207_v20, 0.0 }
  0xb4   : > { %v216_v22 = vadd.f32 %v215_v19, %v214_v16  ;;  %v221_v23 = vadd.f32 %v220_v21, %v219_v18 }
  0xb5   : > { %v209_v30 = vmul.f32 0.003921569, %v208_v25 }
  0xb6   : > { %v217_v24 = vrot.slane %v216_v22, 1  ;;  %v222_v26 = vrot.slane %v221_v23, 2 }
  0xb7   : > { %v210_v34 = vadd.f32 1e-05, %v209_v30 }
  0xb8   : > { %v218_v27 = vadd.f32 %v217_v24, %v216_v22  ;;  %v223_v28 = vadd.f32 %v222_v26, %v221_v23 }
  0xb9   : > { %425 = vrsqrt.f32 %v210_v34 }
  0xba   : > { %v226_v29 = vmul.f32 0.0009765625, %v218_v27  ;;  %v224_v31 = vrot.slane %v223_v28, 1 }
  0xbc   : > { %v227_v32 = vmul.f32 %v226_v29, %v218_v27  ;;  %v225_v33 = vadd.f32 %v224_v31, %v223_v28 }
  0xbe   : > { %v228_v35 = vsub.f32 %v225_v33, %v227_v32 }
  0xc0   : > { %v229_v36 = vmax.f32 %v228_v35, 0.0 }
  0xc2   : > { %v230_v37 = vmul.f32 0.0009775171, %v229_v36 }
  0xc3   : > { %v426_v39 = vpop.eup %425 }
  0xc4   : > { %v231_v38 = vadd.f32 1e-05, %v230_v37  ;;  %v239_v43 = vmul.f32 %v426_v39, %v205_v12  ;;  %v235_v50 = vmul.f32 %v426_v39, %v234_v41 }
  0xc6   : > { %427 = vrsqrt.f32 %v231_v38  ;;  %v240_v46 = vmul.f32 %v239_v43, %v234_v41 }
  0xd0   : > { %v428_v44 = vpop.eup %427 }
  0xd1   : > { %v241_v45 = vmul.f32 %v428_v44, %v226_v29  ;;  %v237_v48 = vmul.f32 %v428_v44, %v236_v42 }
  0xd3   : > { %v242_v47 = vmul.f32 %v241_v45, %v236_v42  ;;  %v238_v53 = vadd.f32 %v237_v48, %v235_v50 }
  0xd5   : > { %v243_v49 = vadd.f32 %v242_v47, %v240_v46  ;;  %v244_v54 = vmul.f32 %v238_v53, %v233_v51 }
  0xd7   : > { %v245_v52 = vmul.f32 %v243_v49, %v233_v51 }
  0xd9   : > { %247 = vrot.lane.b32.xlu1 %v245_v52, %s495_s8 }
  0xdd   : > { %253 = vperm.xlu1 %422, %v244_v54  }
 0x14b   : > { %v248_v55 = vpop.permute.xlu1 %247 }
 0x14c   : > { %v250_v56 = vsub.f32 %v233_v51, %v248_v55 }
 0x14e   : > { %266 = vperm.xlu0 %423, %v250_v56  }
 0x15c   : > { %v254_v63 = vpop.permute.xlu1 %253 }
 0x15d   : > { %v261_v1 = vrot.slane %v254_v63, %v260_v62 }
 0x15f   : > { %v263_v3 = vmul.f32 %v261_v1, %v574_v0 }
 0x1cd   : > { %v267_v2 = vpop.permute.xlu0 %266 }
 0x1ce   : > { %v274_v4 = vrot.slane %v267_v2, %v260_v62 }
 0x1d0   : > { %v276_v5 = vadd.f32 %v274_v4, %v263_v3 }
 0x1d2   : > { %277 = vst [vmem:[%s176_s17] sm:$0xff] %v276_v5 }
 0x1d3   : > { %442 = shalt.err (!%p439_p3)
}
 0x1d4   : > { %s443_s30 = scalar_lea.hbm %s600_s25, 128  ;;  %s447_s6 = scalar_lea.hbm %s645_s3, 256 }
 0x1d5   : > { %p444_p4 = scmp.ne.s32.totalorder %s600_s25, %s443_s30  ;;  %p448_p9 = scmp.lt.u32.totalorder %s600_s25, %s645_s3 }
 0x1d6   : > { %p449_p10 = scmp.lt.u32.totalorder %s447_s6, %s443_s30  ;;  %p451_p12 = scmp.lt.u32.totalorder %s443_s30, %s600_s25 }
 0x1d7   : > { %p445_p7 = pnand %p444_p4, %p556_p5 }
 0x1d8   : > { %p450_p11 = por %p449_p10, %p448_p9 }
 0x1d9   : > { %p446_p8 = pneg %p445_p7 }
 0x1da   : > { %p452_p13 = por %p451_p12, %p450_p11 }
 0x1dc   : > { %p453_p0 = pnand %p452_p13, %p446_p8 }
 0x1de   : > { %456 = shalt.err (!%p453_p0)
}
 0x1df   : > { %379 = dma.vmem_to_hbm [thread:$0]  (%p556_p5), %s602_s19, 128, %s600_s25, %s279_s26  }
 0x1e0 PF: > { %p385_p1 = scmp.ge.s32.totalorder %s491_s15, 2  ;;  %s305_s9 = sand.u32 1, %s479_s12  }
 0x1e1   : > { %s306_s10 = scalar_lea.sflag [#allocation3], %s305_s9 }
 0x1e2   : > { %p382_p2 = pnand %p385_p1, %p560_p6 }
 0x1e4   : > { %474 = dma.done.wait (!%p382_p2), %s306_s10, 128  }
 0x1e5   : > { %476 = vsyncadd (!%p382_p2), %s306_s10, 4294967168  ;;  %p13_p3 = scmp.ge.s32.totalorder %s543_s18, 4   ;;  %s648_s12 = smov %s483_s13 }
 0x1e6   : > { %s649_s13 = smov %s487_s14  ;;  %s650_s14 = smov %s554_s21 }
 0x1e7   : > { %s651_s15 = smov %s543_s18  ;;  %15 = sbr.rel (!%p13_p3) target bundleno = 3 (0x3), region = 70 }
 0x1ee   :  { %311 = vsyncpa [#allocation3], 1 }
 0x1ef   :  { %313 = vsyncpa [#allocation3 + $0x1], 1 }

</bundles_post_ra>
